<compile_context>
chip_gen: v7x
topology: tpu7x:2x2x1
jax: 0.10.0
libtpu: 0.0.40
codegen_flags: <defaults>
</compile_context>

<pallas_src>
import jax
import jax.numpy as jnp
from jax.experimental import pallas as pl
from jax.experimental.pallas import tpu as pltpu


def _update_kernel(vec_ref, scal_ref, wuv_ref, w1s_ref, w1v_ref, b1_ref,
                   w2_ref, b2_ref, out_ref):
    # vec_ref  : (3, tn, C)  compute dtype (xyz component leading)
    # scal_ref : (tn, C)     compute dtype
    # wuv_ref  : (C, 2C)     [W_U.T | W_V.T]
    # w1s/w1v  : (C, C)      MLP layer-1 weight, split by input half (scalar / vnorm)
    # b1_ref   : (1, C)      f32
    # w2_ref   : (C, 3C)     MLP layer-2 weight (output columns ordered a|b|c)
    # b2_ref   : (1, 3C)     f32
    # out_ref  : (tn, 4C)    packed lane-dense output [dv_x | dv_y | dv_z | delta_s]
    _, tn, C = vec_ref.shape

    # --- fused U/V channel mixing: single (3*tn, C) @ (C, 2C) MXU matmul ----
    x = vec_ref[...].reshape(3 * tn, C)                                 # layout no-op (tn % 16 == 0)
    uv = jnp.dot(x, wuv_ref[...], preferred_element_type=jnp.float32)   # (3*tn, 2C) f32
    uv = uv.reshape(3, tn, 2 * C)
    u = uv[:, :, :C]                                                    # (3, tn, C) f32
    v = uv[:, :, C:]                                                    # (3, tn, C) f32

    # --- ||v|| over xyz (f32) ------------------------------------------------
    vnorm = jnp.sqrt(v[0] * v[0] + v[1] * v[1] + v[2] * v[2] + 1e-8)    # (tn, C)

    # --- MLP layer 1: [scalar | vnorm] @ W1.T + b1 ; SiLU (f32) --------------
    h = (jnp.dot(scal_ref[...], w1s_ref[...], preferred_element_type=jnp.float32)
         + jnp.dot(vnorm.astype(w1v_ref.dtype), w1v_ref[...],
                   preferred_element_type=jnp.float32)
         + b1_ref[...])
    h = h * jax.nn.sigmoid(h)                                           # SiLU

    # --- MLP layer 2 (fused a|b|c): single (tn, C) @ (C, 3C) matmul ----------
    m2 = (jnp.dot(h.astype(w2_ref.dtype), w2_ref[...],
                  preferred_element_type=jnp.float32) + b2_ref[...])    # (tn, 3C) f32
    a = m2[:, :C]
    b = m2[:, C:2 * C]
    c = m2[:, 2 * C:]

    # --- outputs: delta_v = u * a, delta_s = b + c * <u, v> ------------------
    dot_uv = u[0] * v[0] + u[1] * v[1] + u[2] * v[2]                    # (tn, C)
    ds = b + c * dot_uv
    slab = jnp.concatenate([u[0] * a, u[1] * a, u[2] * a, ds], axis=-1)  # (tn, 4C)
    out_ref[...] = slab.astype(out_ref.dtype)


def painn_update_packed(vec_3nc, scal, params, *, tile_n=None,
                        compute_dtype=jnp.bfloat16):
    """Kernel-layout entry point (no transposes).

    vec_3nc : (3, N, C)   scal : (N, C)
    returns : (N, 4C) slab = [dv_x | dv_y | dv_z | delta_s] in `compute_dtype`.
    """
    three, N, C = vec_3nc.shape
    assert three == 3
    assert scal.shape == (N, C)

    if tile_n is None:
        tile_n = N
        for cand in (2048, 1024, 512, 256, 128, 64, 32, 16):
            if N % cand == 0:
                tile_n = cand
                break
    tn = tile_n
    assert N % tn == 0, "N must be divisible by tile_n"
    assert tn % 16 == 0 or tn == N, "tile_n must be a multiple of 16 (sublane packing)"

    cdt = compute_dtype
    vec = vec_3nc.astype(cdt)
    scal_c = scal.astype(cdt)

    W_U, W_V = params["W_U"], params["W_V"]          # (C, C) torch layout (out, in)
    W1, b1 = params["W1"], params["b1"]              # (C, 2C), (C,)
    W2, b2 = params["W2"], params["b2"]              # (3C, C), (3C,)

    # Pre-transpose / pre-fuse weights so the kernel only does x @ W.
    wuv = jnp.concatenate([W_U.T, W_V.T], axis=1).astype(cdt)   # (C, 2C)
    w1s = W1[:, :C].T.astype(cdt)                               # scalar half  (C, C)
    w1v = W1[:, C:].T.astype(cdt)                               # vnorm  half  (C, C)
    b1r = b1.reshape(1, C).astype(jnp.float32)
    w2t = W2.T.astype(cdt)                                      # (C, 3C), columns a|b|c
    b2r = b2.reshape(1, 3 * C).astype(jnp.float32)

    grid = (N // tn,)
    full2 = lambda i: (0, 0)
    isz = jnp.dtype(cdt).itemsize
    cost = pl.CostEstimate(
        flops=int(22 * N * C * C),                  # 11*N*C*C MACs
        transcendentals=int(2 * N * C),             # sqrt + sigmoid
        bytes_accessed=int((8 * N * C + 7 * C * C) * isz + 16 * C),
    )

    out = pl.pallas_call(
        _update_kernel,
        grid=grid,
        in_specs=[
            pl.BlockSpec((3, tn, C), lambda i: (0, i, 0)),   # vec (3, N, C)
            pl.BlockSpec((tn, C), lambda i: (i, 0)),         # scalar
            pl.BlockSpec((C, 2 * C), full2),                 # [W_U.T | W_V.T]
            pl.BlockSpec((C, C), full2),                     # W1 scalar half
            pl.BlockSpec((C, C), full2),                     # W1 vnorm half
            pl.BlockSpec((1, C), full2),                     # b1
            pl.BlockSpec((C, 3 * C), full2),                 # W2.T (a|b|c)
            pl.BlockSpec((1, 3 * C), full2),                 # b2
        ],
        out_specs=pl.BlockSpec((tn, 4 * C), lambda i: (i, 0)),
        out_shape=jax.ShapeDtypeStruct((N, 4 * C), cdt),
        compiler_params=pltpu.CompilerParams(
            dimension_semantics=("parallel",)),
        cost_estimate=cost,
    )(vec, scal_c, wuv, w1s, w1v, b1r, w2t, b2r)
    return out


def painn_update(vector_embeddings, scalar_embeddings, params, *, tile_n=None,
                 compute_dtype=jnp.bfloat16):
    """PyTorch-layout entry: vec (N, C, 3), scal (N, C) -> (delta_v (N,C,3), delta_s (N,C))."""
    N, C, three = vector_embeddings.shape
    assert three == 3
    # TODO(synk): in a full PaiNN stack keep vectors in the (3, N, C) kernel layout
    # across message/update blocks so these boundary transposes disappear entirely.
    vec_3nc = jnp.transpose(vector_embeddings, (2, 0, 1))
    out = painn_update_packed(vec_3nc, scalar_embeddings, params,
                              tile_n=tile_n, compute_dtype=compute_dtype)
    delta_v = jnp.transpose(out[:, :3 * C].reshape(N, 3, C), (0, 2, 1))
    delta_s = out[:, 3 * C:]
    return delta_v, delta_s


def reference_update(vector_embeddings, scalar_embeddings, params):
    """Pure-JAX mirror of the PyTorch forward for verification (f32)."""
    C = scalar_embeddings.shape[-1]
    W_U, W_V = params["W_U"], params["W_V"]
    W1, b1, W2, b2 = params["W1"], params["b1"], params["W2"], params["b2"]

    u = jnp.einsum("ncd,kc->nkd", vector_embeddings, W_U)
    v = jnp.einsum("ncd,kc->nkd", vector_embeddings, W_V)
    vnorm = jnp.sqrt(jnp.sum(v * v, axis=-1) + 1e-8)
    m = jnp.concatenate([scalar_embeddings, vnorm], axis=-1)
    h = jax.nn.silu(m @ W1.T + b1)
    out = h @ W2.T + b2
    a, b, c = out[:, :C], out[:, C:2 * C], out[:, 2 * C:]
    delta_v = u * a[:, :, None]
    dot = jnp.sum(u * v, axis=-1)
    delta_s = b + c * dot
    return delta_v, delta_s


def make_params(key, channels):
    """Deterministic synthetic parameters matching Update(channels).__init__ shapes."""
    C = channels
    ks = jax.random.split(key, 6)
    return {
        "W_U": jax.random.normal(ks[0], (C, C), jnp.float32) * 0.1,      # VectorLinear U (out, in)
        "W_V": jax.random.normal(ks[1], (C, C), jnp.float32) * 0.1,      # VectorLinear V
        "W1": jax.random.normal(ks[2], (C, 2 * C), jnp.float32) * 0.1,   # MLP: Linear(2C, C)
        "b1": jax.random.normal(ks[3], (C,), jnp.float32) * 0.1,
        "W2": jax.random.normal(ks[4], (3 * C, C), jnp.float32) * 0.1,   # MLP: Linear(C, 3C)
        "b2": jax.random.normal(ks[5], (3 * C,), jnp.float32) * 0.1,
    }


if __name__ == "__main__":
    N, C = 128, 32   # atoms, channels (small demo shapes)

    key = jax.random.PRNGKey(0)
    k_vec, k_scal, k_par = jax.random.split(key, 3)

    vector_embeddings = jax.random.normal(k_vec, (N, C, 3), jnp.float32)
    scalar_embeddings = jax.random.normal(k_scal, (N, C), jnp.float32)
    params = make_params(k_par, C)

    ref_v, ref_s = reference_update(vector_embeddings, scalar_embeddings, params)

    # Strict numerical check: f32 compute path (tile_n=32 -> 4 pipelined grid steps).
    dv32, ds32 = painn_update(vector_embeddings, scalar_embeddings, params,
                              tile_n=32, compute_dtype=jnp.float32)
    jax.block_until_ready((dv32, ds32))
    assert dv32.shape == (N, C, 3) and ds32.shape == (N, C)
    assert jnp.allclose(dv32, ref_v, rtol=1e-5, atol=1e-5)
    assert jnp.allclose(ds32, ref_s, rtol=1e-5, atol=1e-5)

    # Performance path: bf16 matmul operands / outputs, f32 accumulation.
    # Looser tolerance purely reflects bf16 operand rounding.
    dv16, ds16 = painn_update(vector_embeddings, scalar_embeddings, params,
                              tile_n=32, compute_dtype=jnp.bfloat16)
    jax.block_until_ready((dv16, ds16))
    assert jnp.allclose(dv16.astype(jnp.float32), ref_v, rtol=5e-2, atol=1e-1)
    assert jnp.allclose(ds16.astype(jnp.float32), ref_s, rtol=5e-2, atol=1e-1)

    print("KERNEL_OK")
</pallas_src>

<mosaic_0001>
module attributes {stable_mosaic.version = 11 : i64} {
  func.func @_update_kernel(%arg0: i32, %arg1: memref<3x32x32xf32, #tpu.memory_space<vmem>>, %arg2: memref<32x32xf32, #tpu.memory_space<vmem>>, %arg3: memref<32x64xf32, #tpu.memory_space<vmem>>, %arg4: memref<32x32xf32, #tpu.memory_space<vmem>>, %arg5: memref<32x32xf32, #tpu.memory_space<vmem>>, %arg6: memref<1x32xf32, #tpu.memory_space<vmem>>, %arg7: memref<32x96xf32, #tpu.memory_space<vmem>>, %arg8: memref<1x96xf32, #tpu.memory_space<vmem>>, %arg9: memref<32x128xf32, #tpu.memory_space<vmem>>) attributes {dimension_semantics = [#tpu.dimension_semantics<parallel>], iteration_bounds = array<i64: 4>, scalar_prefetch = 0 : i64, scratch_operands = 0 : i64, tpu.core_type = #tpu.core_type<tc>, window_params = [{transform_indices = @transform_0, window_bounds = array<i64: 3, 32, 32>}, {transform_indices = @transform_1, window_bounds = array<i64: 32, 32>}, {pipeline_mode = #tpu.pipeline_mode<synchronous>, transform_indices = @transform_2, window_bounds = array<i64: 32, 64>}, {pipeline_mode = #tpu.pipeline_mode<synchronous>, transform_indices = @transform_3, window_bounds = array<i64: 32, 32>}, {pipeline_mode = #tpu.pipeline_mode<synchronous>, transform_indices = @transform_4, window_bounds = array<i64: 32, 32>}, {pipeline_mode = #tpu.pipeline_mode<synchronous>, transform_indices = @transform_5, window_bounds = array<i64: 1, 32>}, {pipeline_mode = #tpu.pipeline_mode<synchronous>, transform_indices = @transform_6, window_bounds = array<i64: 32, 96>}, {pipeline_mode = #tpu.pipeline_mode<synchronous>, transform_indices = @transform_7, window_bounds = array<i64: 1, 96>}, {transform_indices = @transform_8, window_bounds = array<i64: 32, 128>}]} {
    %c0 = arith.constant 0 : index
    %c0_0 = arith.constant 0 : index
    %c0_1 = arith.constant 0 : index
    %0 = vector.load %arg1[%c0, %c0_0, %c0_1] : memref<3x32x32xf32, #tpu.memory_space<vmem>>, vector<3x32x32xf32>
    %1 = vector.shape_cast %0 : vector<3x32x32xf32> to vector<96x32xf32>
    %c0_2 = arith.constant 0 : index
    %c0_3 = arith.constant 0 : index
    %2 = vector.load %arg3[%c0_2, %c0_3] : memref<32x64xf32, #tpu.memory_space<vmem>>, vector<32x64xf32>
    %cst = arith.constant dense<0.000000e+00> : vector<96x64xf32>
    %3 = tpu.matmul %1, %2, %cst {dimension_numbers = #tpu.dot_dimension_numbers<[1], [0], [0], [1], [0, 0, 1, 1], [], []>} : vector<96x32xf32>, vector<32x64xf32>, vector<96x64xf32> -> vector<96x64xf32>
    %4 = vector.shape_cast %3 : vector<96x64xf32> to vector<3x32x64xf32>
    %5 = vector.extract_strided_slice %4 {offsets = [0, 0, 0], sizes = [3, 32, 32], strides = [1, 1, 1]} : vector<3x32x64xf32> to vector<3x32x32xf32>
    %6 = vector.extract_strided_slice %4 {offsets = [0, 0, 32], sizes = [3, 32, 32], strides = [1, 1, 1]} : vector<3x32x64xf32> to vector<3x32x32xf32>
    %7 = vector.extract_strided_slice %6 {offsets = [0, 0, 0], sizes = [1, 32, 32], strides = [1, 1, 1]} : vector<3x32x32xf32> to vector<1x32x32xf32>
    %8 = vector.shape_cast %7 : vector<1x32x32xf32> to vector<32x32xf32>
    %9 = vector.extract_strided_slice %6 {offsets = [0, 0, 0], sizes = [1, 32, 32], strides = [1, 1, 1]} : vector<3x32x32xf32> to vector<1x32x32xf32>
    %10 = vector.shape_cast %9 : vector<1x32x32xf32> to vector<32x32xf32>
    %11 = arith.mulf %8, %10 : vector<32x32xf32>
    %12 = vector.extract_strided_slice %6 {offsets = [1, 0, 0], sizes = [1, 32, 32], strides = [1, 1, 1]} : vector<3x32x32xf32> to vector<1x32x32xf32>
    %13 = vector.shape_cast %12 : vector<1x32x32xf32> to vector<32x32xf32>
    %14 = vector.extract_strided_slice %6 {offsets = [1, 0, 0], sizes = [1, 32, 32], strides = [1, 1, 1]} : vector<3x32x32xf32> to vector<1x32x32xf32>
    %15 = vector.shape_cast %14 : vector<1x32x32xf32> to vector<32x32xf32>
    %16 = arith.mulf %13, %15 : vector<32x32xf32>
    %17 = arith.addf %11, %16 : vector<32x32xf32>
    %18 = vector.extract_strided_slice %6 {offsets = [2, 0, 0], sizes = [1, 32, 32], strides = [1, 1, 1]} : vector<3x32x32xf32> to vector<1x32x32xf32>
    %19 = vector.shape_cast %18 : vector<1x32x32xf32> to vector<32x32xf32>
    %20 = vector.extract_strided_slice %6 {offsets = [2, 0, 0], sizes = [1, 32, 32], strides = [1, 1, 1]} : vector<3x32x32xf32> to vector<1x32x32xf32>
    %21 = vector.shape_cast %20 : vector<1x32x32xf32> to vector<32x32xf32>
    %22 = arith.mulf %19, %21 : vector<32x32xf32>
    %23 = arith.addf %17, %22 : vector<32x32xf32>
    %cst_4 = arith.constant 9.99999993E-9 : f32
    %24 = vector.broadcast %cst_4 : f32 to vector<32x32xf32>
    %25 = arith.addf %23, %24 : vector<32x32xf32>
    %26 = math.sqrt %25 : vector<32x32xf32>
    %c0_5 = arith.constant 0 : index
    %c0_6 = arith.constant 0 : index
    %27 = vector.load %arg2[%c0_5, %c0_6] : memref<32x32xf32, #tpu.memory_space<vmem>>, vector<32x32xf32>
    %c0_7 = arith.constant 0 : index
    %c0_8 = arith.constant 0 : index
    %28 = vector.load %arg4[%c0_7, %c0_8] : memref<32x32xf32, #tpu.memory_space<vmem>>, vector<32x32xf32>
    %cst_9 = arith.constant dense<0.000000e+00> : vector<32x32xf32>
    %29 = tpu.matmul %27, %28, %cst_9 {dimension_numbers = #tpu.dot_dimension_numbers<[1], [0], [0], [1], [0, 0, 1, 1], [], []>} : vector<32x32xf32>, vector<32x32xf32>, vector<32x32xf32> -> vector<32x32xf32>
    %c0_10 = arith.constant 0 : index
    %c0_11 = arith.constant 0 : index
    %30 = vector.load %arg5[%c0_10, %c0_11] : memref<32x32xf32, #tpu.memory_space<vmem>>, vector<32x32xf32>
    %cst_12 = arith.constant dense<0.000000e+00> : vector<32x32xf32>
    %31 = tpu.matmul %26, %30, %cst_12 {dimension_numbers = #tpu.dot_dimension_numbers<[1], [0], [0], [1], [0, 0, 1, 1], [], []>} : vector<32x32xf32>, vector<32x32xf32>, vector<32x32xf32> -> vector<32x32xf32>
    %32 = arith.addf %29, %31 : vector<32x32xf32>
    %c0_13 = arith.constant 0 : index
    %c0_14 = arith.constant 0 : index
    %33 = vector.load %arg6[%c0_13, %c0_14] : memref<1x32xf32, #tpu.memory_space<vmem>>, vector<1x32xf32>
    %34 = vector.broadcast %33 : vector<1x32xf32> to vector<32x32xf32>
    %35 = arith.addf %32, %34 : vector<32x32xf32>
    %36 = arith.negf %35 : vector<32x32xf32>
    %37 = math.exp %36 : vector<32x32xf32>
    %cst_15 = arith.constant 1.000000e+00 : f32
    %38 = vector.broadcast %cst_15 : f32 to vector<32x32xf32>
    %39 = arith.addf %38, %37 : vector<32x32xf32>
    %40 = arith.divf %38, %39 : vector<32x32xf32>
    %41 = arith.mulf %35, %40 : vector<32x32xf32>
    %c0_16 = arith.constant 0 : index
    %c0_17 = arith.constant 0 : index
    %42 = vector.load %arg7[%c0_16, %c0_17] : memref<32x96xf32, #tpu.memory_space<vmem>>, vector<32x96xf32>
    %cst_18 = arith.constant dense<0.000000e+00> : vector<32x96xf32>
    %43 = tpu.matmul %41, %42, %cst_18 {dimension_numbers = #tpu.dot_dimension_numbers<[1], [0], [0], [1], [0, 0, 1, 1], [], []>} : vector<32x32xf32>, vector<32x96xf32>, vector<32x96xf32> -> vector<32x96xf32>
    %c0_19 = arith.constant 0 : index
    %c0_20 = arith.constant 0 : index
    %44 = vector.load %arg8[%c0_19, %c0_20] : memref<1x96xf32, #tpu.memory_space<vmem>>, vector<1x96xf32>
    %45 = vector.broadcast %44 : vector<1x96xf32> to vector<32x96xf32>
    %46 = arith.addf %43, %45 : vector<32x96xf32>
    %47 = vector.extract_strided_slice %46 {offsets = [0, 0], sizes = [32, 32], strides = [1, 1]} : vector<32x96xf32> to vector<32x32xf32>
    %48 = vector.extract_strided_slice %46 {offsets = [0, 32], sizes = [32, 32], strides = [1, 1]} : vector<32x96xf32> to vector<32x32xf32>
    %49 = vector.extract_strided_slice %46 {offsets = [0, 64], sizes = [32, 32], strides = [1, 1]} : vector<32x96xf32> to vector<32x32xf32>
    %50 = vector.extract_strided_slice %5 {offsets = [0, 0, 0], sizes = [1, 32, 32], strides = [1, 1, 1]} : vector<3x32x32xf32> to vector<1x32x32xf32>
    %51 = vector.shape_cast %50 : vector<1x32x32xf32> to vector<32x32xf32>
    %52 = vector.extract_strided_slice %6 {offsets = [0, 0, 0], sizes = [1, 32, 32], strides = [1, 1, 1]} : vector<3x32x32xf32> to vector<1x32x32xf32>
    %53 = vector.shape_cast %52 : vector<1x32x32xf32> to vector<32x32xf32>
    %54 = arith.mulf %51, %53 : vector<32x32xf32>
    %55 = vector.extract_strided_slice %5 {offsets = [1, 0, 0], sizes = [1, 32, 32], strides = [1, 1, 1]} : vector<3x32x32xf32> to vector<1x32x32xf32>
    %56 = vector.shape_cast %55 : vector<1x32x32xf32> to vector<32x32xf32>
    %57 = vector.extract_strided_slice %6 {offsets = [1, 0, 0], sizes = [1, 32, 32], strides = [1, 1, 1]} : vector<3x32x32xf32> to vector<1x32x32xf32>
    %58 = vector.shape_cast %57 : vector<1x32x32xf32> to vector<32x32xf32>
    %59 = arith.mulf %56, %58 : vector<32x32xf32>
    %60 = arith.addf %54, %59 : vector<32x32xf32>
    %61 = vector.extract_strided_slice %5 {offsets = [2, 0, 0], sizes = [1, 32, 32], strides = [1, 1, 1]} : vector<3x32x32xf32> to vector<1x32x32xf32>
    %62 = vector.shape_cast %61 : vector<1x32x32xf32> to vector<32x32xf32>
    %63 = vector.extract_strided_slice %6 {offsets = [2, 0, 0], sizes = [1, 32, 32], strides = [1, 1, 1]} : vector<3x32x32xf32> to vector<1x32x32xf32>
    %64 = vector.shape_cast %63 : vector<1x32x32xf32> to vector<32x32xf32>
    %65 = arith.mulf %62, %64 : vector<32x32xf32>
    %66 = arith.addf %60, %65 : vector<32x32xf32>
    %67 = arith.mulf %49, %66 : vector<32x32xf32>
    %68 = arith.addf %48, %67 : vector<32x32xf32>
    %69 = vector.extract_strided_slice %5 {offsets = [0, 0, 0], sizes = [1, 32, 32], strides = [1, 1, 1]} : vector<3x32x32xf32> to vector<1x32x32xf32>
    %70 = vector.shape_cast %69 : vector<1x32x32xf32> to vector<32x32xf32>
    %71 = arith.mulf %70, %47 : vector<32x32xf32>
    %72 = vector.extract_strided_slice %5 {offsets = [1, 0, 0], sizes = [1, 32, 32], strides = [1, 1, 1]} : vector<3x32x32xf32> to vector<1x32x32xf32>
    %73 = vector.shape_cast %72 : vector<1x32x32xf32> to vector<32x32xf32>
    %74 = arith.mulf %73, %47 : vector<32x32xf32>
    %75 = vector.extract_strided_slice %5 {offsets = [2, 0, 0], sizes = [1, 32, 32], strides = [1, 1, 1]} : vector<3x32x32xf32> to vector<1x32x32xf32>
    %76 = vector.shape_cast %75 : vector<1x32x32xf32> to vector<32x32xf32>
    %77 = arith.mulf %76, %47 : vector<32x32xf32>
    %78 = tpu.concatenate %71, %74, %77, %68 in 1 : vector<32x32xf32>, vector<32x32xf32>, vector<32x32xf32>, vector<32x32xf32> -> vector<32x128xf32>
    %c0_21 = arith.constant 0 : index
    %c0_22 = arith.constant 0 : index
    %79 = vector.load %arg9[%c0_21, %c0_22] : memref<32x128xf32, #tpu.memory_space<vmem>>, vector<32x128xf32>
    tpu.vector_store %arg9[%c0_21, %c0_22], %78 {strides = array<i32>} : memref<32x128xf32, #tpu.memory_space<vmem>>, vector<32x128xf32>,
    return
  }
  func.func @transform_0(%arg0: i32) -> (i32, i32, i32) {
    %c0_i32 = arith.constant 0 : i32
    %c0_i32_0 = arith.constant 0 : i32
    %c0_i32_1 = arith.constant 0 : i32
    return %c0_i32, %arg0, %c0_i32_0 : i32, i32, i32
  }
  func.func @transform_1(%arg0: i32) -> (i32, i32) {
    %c0_i32 = arith.constant 0 : i32
    %c0_i32_0 = arith.constant 0 : i32
    return %arg0, %c0_i32 : i32, i32
  }
  func.func @transform_2(%arg0: i32) -> (i32, i32) {
    %c0_i32 = arith.constant 0 : i32
    %c0_i32_0 = arith.constant 0 : i32
    %c0_i32_1 = arith.constant 0 : i32
    return %c0_i32, %c0_i32_0 : i32, i32
  }
  func.func @transform_3(%arg0: i32) -> (i32, i32) {
    %c0_i32 = arith.constant 0 : i32
    %c0_i32_0 = arith.constant 0 : i32
    %c0_i32_1 = arith.constant 0 : i32
    return %c0_i32, %c0_i32_0 : i32, i32
  }
  func.func @transform_4(%arg0: i32) -> (i32, i32) {
    %c0_i32 = arith.constant 0 : i32
    %c0_i32_0 = arith.constant 0 : i32
    %c0_i32_1 = arith.constant 0 : i32
    return %c0_i32, %c0_i32_0 : i32, i32
  }
  func.func @transform_5(%arg0: i32) -> (i32, i32) {
    %c0_i32 = arith.constant 0 : i32
    %c0_i32_0 = arith.constant 0 : i32
    %c0_i32_1 = arith.constant 0 : i32
    return %c0_i32, %c0_i32_0 : i32, i32
  }
  func.func @transform_6(%arg0: i32) -> (i32, i32) {
    %c0_i32 = arith.constant 0 : i32
    %c0_i32_0 = arith.constant 0 : i32
    %c0_i32_1 = arith.constant 0 : i32
    return %c0_i32, %c0_i32_0 : i32, i32
  }
  func.func @transform_7(%arg0: i32) -> (i32, i32) {
    %c0_i32 = arith.constant 0 : i32
    %c0_i32_0 = arith.constant 0 : i32
    %c0_i32_1 = arith.constant 0 : i32
    return %c0_i32, %c0_i32_0 : i32, i32
  }
  func.func @transform_8(%arg0: i32) -> (i32, i32) {
    %c0_i32 = arith.constant 0 : i32
    %c0_i32_0 = arith.constant 0 : i32
    return %arg0, %c0_i32 : i32, i32
  }
}

</mosaic_0001>

<bundles_post_ra>
// kernel: tpu_custom_call.1
= control target key start
LH: loop header
LB: loop body
LE: loop exit
PB: predicated region body
PF: predicated region fallthrough
CT: control target
= control target key end

     0   :  { %13 = vsyncpa [#allocation4], 0  ;;  %s1972_s0 = inlined_call_operand.vmem [shape: f32[3,128,32], index: 0, kind: input, shape index: {}]   ;;  %s1973_s1 = inlined_call_operand.vmem [shape: f32[128,32], index: 1, kind: input, shape index: {}]   ;;  %s1974_s2 = inlined_call_operand.vmem [shape: f32[32,64], index: 2, kind: input, shape index: {}]   ;;  %s1975_s3 = inlined_call_operand.vmem [shape: f32[32,32], index: 3, kind: input, shape index: {}]   ;;  %s1976_s4 = inlined_call_operand.vmem [shape: f32[32,32], index: 4, kind: input, shape index: {}]   ;;  %s1977_s5 = inlined_call_operand.vmem [shape: f32[1,32], index: 5, kind: input, shape index: {}]   ;;  %s1978_s6 = inlined_call_operand.vmem [shape: f32[32,96], index: 6, kind: input, shape index: {}]   ;;  %s1979_s7 = inlined_call_operand.vmem [shape: f32[1,96], index: 7, kind: input, shape index: {}]   ;;  %s1980_s8 = inlined_call_operand.hbm [shape: f32[128,128], index: 8, kind: output, shape index: {}]  }
   0x1   :  { %15 = vsyncpa [#allocation4 + $0x1], 0  ;;  %s1653_s27 = smov 0   ;;  %s1655_s28 = smov 0  }
   0x2   :  { %s1657_s29 = smov 0   ;;  %s1659_s30 = smov 0  }
   0x3 LB: > { %s1674_s9 = sadd.s32 4294967295, %s1600_s30   ;;  %s1278_s10 = sadd.s32 4294967294, %s1600_s30   ;;  %s1600_s30 = sphi %s1659_s30, %s1986_s30   ;;  %s1596_s29 = sphi %s1657_s29, %s1985_s29   ;;  %s1592_s28 = sphi %s1655_s28, %s1984_s28   ;;  %s1588_s27 = sphi %s1653_s27, %s1983_s27  }
   0x4   : > { %s1678_s11 = sadd.s32 1, %s1600_s30   ;;  %s28_s12 = sadd.s32 1, %s1596_s29 }
   0x5   : > { %s25_s13 = ssub.s32 %s1600_s30, %s1678_s11  ;;  %p35_p0 = scmp.ne.s32.totalorder %s1596_s29, %s1592_s28 }
   0x6   : > { %p26_p1 = scmp.eq.s32.totalorder %s25_s13, 0  ;;  %p36_p2 = scmp.eq.s32.totalorder %s1600_s30, 0 }
   0x7   : > { %p217_p3 = scmp.eq.s32.totalorder %s1674_s9, 3  ;;  %p222_p4 = scmp.ne.s32.totalorder %s1592_s28, %s1588_s27 }
   0x8   : > { %s1690_s14 = scalar_select %p26_p1, %s1596_s29, %s28_s12  }
   0x9   : > { %p37_p5 = por %p36_p2, %p35_p0  ;;  %p1692_p6 = por %p217_p3, %p35_p0 }
   0xa   : > { %p223_p7 = scmp.eq.s32.totalorder %s1278_s10, 3  ;;  %p1280_p9 = scmp.ge.s32.totalorder %s1600_s30, 4 }
   0xc   : > { %p1696_p8 = por %p223_p7, %p222_p4  ;;  %257 = sbr.rel (%p1280_p9) target bundleno = 30 (0x1e), region = 40 }
  0x13   : > { %260 = sbr.rel (!%p37_p5) target bundleno = 30 (0x1e), region = 44  ;;  %s262_s17 = sand.u32 (%p37_p5), 1, %s1596_s29  }
  0x14   : > { %s1322_s18 = sshll.u32 (%p37_p5), %s1600_s30, 5  ;;  %s1468_s19 = smul.u32 (%p37_p5), 96, %s262_s17 }
  0x15   : > { %s267_s22 = scalar_lea.vmem (%p37_p5), %s1972_s0, %s1322_s18 }
  0x16   : > { %v317_v0 = vld [vmem:[%s267_s22] sm:$0xff] (%p37_p5)  ;;  %v319_v1 = vld [vmem:[%s267_s22 + $0x8] sm:$0xff] (%p37_p5)  ;;  %v321_v2 = vld [vmem:[%s267_s22 + $0x10] sm:$0xff] (%p37_p5)  ;;  %s264_s23 = scalar_lea.vmem (%p37_p5), [#allocation2], %s1468_s19 }
  0x17   : > { %v323_v3 = vld [vmem:[%s267_s22 + $0x18] sm:$0xff] (%p37_p5)  ;;  %v325_v4 = vld [vmem:[%s267_s22 + $0x80] sm:$0xff] (%p37_p5)  ;;  %v327_v5 = vld [vmem:[%s267_s22 + $0x88] sm:$0xff] (%p37_p5)  ;;  %318 = vst [vmem:[%s264_s23] sm:$0xff] (%p37_p5), %v317_v0 }
  0x18   : > { %320 = vst [vmem:[%s264_s23 + $0x8] sm:$0xff] (%p37_p5), %v319_v1  ;;  %322 = vst [vmem:[%s264_s23 + $0x10] sm:$0xff] (%p37_p5), %v321_v2  ;;  %v329_v6 = vld [vmem:[%s267_s22 + $0x90] sm:$0xff] (%p37_p5)  ;;  %v331_v7 = vld [vmem:[%s267_s22 + $0x98] sm:$0xff] (%p37_p5) }
  0x19   : > { %324 = vst [vmem:[%s264_s23 + $0x18] sm:$0xff] (%p37_p5), %v323_v3  ;;  %326 = vst [vmem:[%s264_s23 + $0x20] sm:$0xff] (%p37_p5), %v325_v4  ;;  %v333_v8 = vld [vmem:[%s267_s22 + $0x100] sm:$0xff] (%p37_p5)  ;;  %v335_v9 = vld [vmem:[%s267_s22 + $0x108] sm:$0xff] (%p37_p5) }
  0x1a   : > { %328 = vst [vmem:[%s264_s23 + $0x28] sm:$0xff] %v327_v5  ;;  %330 = vst [vmem:[%s264_s23 + $0x30] sm:$0xff] %v329_v6  ;;  %v337_v10 = vld [vmem:[%s267_s22 + $0x110] sm:$0xff]  ;;  %v339_v11 = vld [vmem:[%s267_s22 + $0x118] sm:$0xff] }
  0x1b   : > { %332 = vst [vmem:[%s264_s23 + $0x38] sm:$0xff] %v331_v7  ;;  %334 = vst [vmem:[%s264_s23 + $0x40] sm:$0xff] %v333_v8 }
  0x1c   : > { %336 = vst [vmem:[%s264_s23 + $0x48] sm:$0xff] %v335_v9  ;;  %338 = vst [vmem:[%s264_s23 + $0x50] sm:$0xff] %v337_v10 }
  0x1d   : > { %340 = vst [vmem:[%s264_s23 + $0x58] sm:$0xff] %v339_v11 }
  0x1e PF: > { %p1283_p10 = scmp.ge.s32.totalorder %s1600_s30, 1  ;;  %p354_p11 = scmp.lt.s32.totalorder %s1600_s30, 5 }
  0x20   : > { %p355_p12 = pnand %p1283_p10, %p354_p11 }
  0x21   : > { %v419_v12 = vld [vmem:[%s1974_s2] sm:$0xff] (!%p355_p12)  ;;  %v420_v13 = vld [vmem:[%s1974_s2 + $0x8] sm:$0xff] (!%p355_p12)  ;;  %v421_v14 = vld [vmem:[%s1974_s2 + $0x10] sm:$0xff] (!%p355_p12)  ;;  %s1718_s17 = sand.u32 (!%p355_p12), 1, %s1592_s28   ;;  %vm423_vm0 = vcmask (!%p355_p12), 261120   ;;  %s1602_s22 = smov (!%p355_p12), 96  }
  0x22   : > { %358 = sbr.rel (%p355_p12) target bundleno = 1134 (0x46e), region = 86  ;;  %v1432_v15 = vpack.c.bf16 (!%p355_p12), %v420_v13, %v419_v12  ;;  %v422_v16 = vld [vmem:[%s1974_s2 + $0x18] sm:$0xff] (!%p355_p12)  ;;  %v645_v30 = vld [vmem:[%s1976_s4] sm:$0xff] (!%p355_p12)  ;;  %v646_v31 = vld [vmem:[%s1976_s4 + $0x8] sm:$0xff] (!%p355_p12)  ;;  %s1285_s23 = sshll.u32 (!%p355_p12), %s1674_s9, 2  ;;  %vm1170_vm9 = vcmask (!%p355_p12), 523264  }
  0x23   : > { %s1469_s20 = smul.u32 (!%p355_p12), 96, %s1718_s17  ;;  %v1436_v17 = vpack.c.bf16 (!%p355_p12), %v422_v16, %v421_v14  ;;  %v647_v32 = vld [vmem:[%s1976_s4 + $0x10] sm:$0xff] (!%p355_p12)  ;;  %v1440_v33 = vpack.c.bf16 (!%p355_p12), %v646_v31, %v645_v30  ;;  %v648_v34 = vld [vmem:[%s1976_s4 + $0x18] sm:$0xff] (!%p355_p12)  ;;  %v641_v8 = vld [vmem:[%s1975_s3] sm:$0xff] (!%p355_p12)  ;;  %p401_p13 = scmp.lt.s32.totalorder (!%p355_p12), %s1285_s23, 15  ;;  %vm1175_vm10 = vcmask (!%p355_p12), 785408  }
  0x24   : > { %1433 = vmatprep.subr.bf16.mxu0 (!%p355_p12), %v1432_v15  ;;  %v1444_v35 = vpack.c.bf16 (!%p355_p12), %v648_v34, %v647_v32  ;;  %v642_v9 = vld [vmem:[%s1975_s3 + $0x8] sm:$0xff] (!%p355_p12)  ;;  %v643_v32 = vld [vmem:[%s1975_s3 + $0x10] sm:$0xff] (!%p355_p12)  ;;  %s1604_s24 = smov (!%p355_p12), 32   ;;  %s1323_s26 = sshll.u32 (!%p355_p12), %s1674_s9, 9 }
  0x25   : > { %1435 = vmatpush3.bf16.msra.mxu0 (!%p355_p12), %v1432_v15  ;;  %s363_s21 = scalar_lea.vmem (!%p355_p12), [#allocation2], %s1469_s20  ;;  %1441 = vmatprep.subr.bf16.mxu1 (!%p355_p12), %v1440_v33  ;;  %v1448_v10 = vpack.c.bf16 (!%p355_p12), %v642_v9, %v641_v8  ;;  %s1603_s20 = smov (!%p355_p12), 64  }
  0x26   : > { %v407_v18 = vld [vmem:[%s363_s21] sm:$0xff] (!%p355_p12)  ;;  %1437 = vmatprep.subr.bf16.mxu0 (!%p355_p12), %v1436_v17  ;;  %v408_v19 = vld [vmem:[%s363_s21 + $0x8] sm:$0xff] (!%p355_p12)  ;;  %v409_v20 = vld [vmem:[%s363_s21 + $0x10] sm:$0xff] (!%p355_p12)  ;;  %1443 = vmatpush3.bf16.msra.mxu1 (!%p355_p12), %v1440_v33  ;;  %s1185_s13 = scalar_lea.sflag (!%p355_p12), [#allocation4], %s1718_s17 }
  0x27   : > { %1372 = vmatprep.mubr.msk.f32.mxu0 (!%p355_p12), %vm423_vm0, %v407_v18  ;;  %v410_v21 = vld [vmem:[%s363_s21 + $0x18] sm:$0xff] (!%p355_p12)  ;;  %v411_v22 = vld [vmem:[%s363_s21 + $0x20] sm:$0xff] (!%p355_p12)  ;;  %v412_v23 = vld [vmem:[%s363_s21 + $0x28] sm:$0xff] (!%p355_p12)  ;;  %1445 = vmatprep.subr.bf16.mxu1 (!%p355_p12), %v1444_v35 }
  0x28   : > { %v413_v24 = vld [vmem:[%s363_s21 + $0x30] sm:$0xff] (!%p355_p12)  ;;  %v414_v25 = vld [vmem:[%s363_s21 + $0x38] sm:$0xff] (!%p355_p12)  ;;  %v415_v26 = vld [vmem:[%s363_s21 + $0x40] sm:$0xff] (!%p355_p12) }
  0x29   : > { %1439 = vmatpush3.bf16.msra.mxu0 %v1436_v17  ;;  %v416_v27 = vld [vmem:[%s363_s21 + $0x48] sm:$0xff]  ;;  %v417_v28 = vld [vmem:[%s363_s21 + $0x50] sm:$0xff]  ;;  %v418_v29 = vld [vmem:[%s363_s21 + $0x58] sm:$0xff]  ;;  %s1988_s23 = smov (!%p401_p13, %s1285_s23), 15 }
  0x2a   : > { %1447 = vmatpush3.bf16.msra.mxu1 %v1444_v35  ;;  %v644_v33 = vld [vmem:[%s1975_s3 + $0x18] sm:$0xff]  ;;  %s1286_s12 = sshll.u32 %s1988_s23, 3 }
  0x2b   : > { %1449 = vmatprep.subr.bf16.mxu1 %v1448_v10  ;;  %v1452_v34 = vpack.c.bf16 %v644_v33, %v643_v32  ;;  %s404_s19 = scalar_lea.vmem %s1973_s1, %s1286_s12  ;;  %s1926_s12 = scalar_lea.hbm %s1980_s8, %s1323_s26 }
  0x2c   : > { %1373 = vmatmul.mubr.msk.f32.vlgmr.msra.gmra.mrb[0].mxu0 %vm423_vm0, %v408_v19 }
  0x2d   : > { %1375 = vmatprep.mubr.msk.f32.mxu0 %vm423_vm0, %v409_v20 }
  0x30   : > { %1376 = vmatmul.mubr.msk.f32.gmra.mrb[2].mxu0 %vm423_vm0, %v410_v21 }
  0x31   : > { %1378 = vmatprep.mubr.msk.f32.mxu0 %vm423_vm0, %v411_v22 }
  0x34   : > { %1379 = vmatmul.mubr.msk.f32.gmra.mrb[4].mxu0 %vm423_vm0, %v412_v23 }
  0x35   : > { %1381 = vmatprep.mubr.msk.f32.mxu0 %vm423_vm0, %v413_v24 }
  0x38   : > { %1382 = vmatmul.mubr.msk.f32.gmra.mrb[6].mxu0 %vm423_vm0, %v414_v25 }
  0x39   : > { %1384 = vmatprep.mubr.msk.f32.mxu0 %vm423_vm0, %v415_v26 }
  0x3c   : > { %1385 = vmatmul.mubr.msk.f32.gmra.mrb[8].mxu0 %vm423_vm0, %v416_v27 }
  0x3d   : > { %1387 = vmatprep.mubr.msk.f32.mxu0 %vm423_vm0, %v417_v28 }
  0x40   : > { %1388 = vmatmul.mubr.msk.f32.gmra.mrb[10].mxu0 %vm423_vm0, %v418_v29 }
  0xff   : > { %v1748_v36 = vpop.f32.mrb[0].mxu0 }
 0x100   : > { %v1750_v37 = vpop.f32.mrb[1].mxu0  ;;  %v586_v41 = vmul.f32 %v1748_v36, %v1748_v36 }
 0x101   : > { %v585_v44 = vmul.f32 %v1750_v37, %v1750_v37 }
 0x103   : > { %v1752_v38 = vpop.f32.mrb[2].mxu0 }
 0x104   : > { %v1754_v39 = vpop.f32.mrb[3].mxu0  ;;  %v588_v49 = vmul.f32 %v1752_v38, %v1752_v38 }
 0x105   : > { %v587_v52 = vmul.f32 %v1754_v39, %v1754_v39 }
 0x107   : > { %v1756_v40 = vpop.f32.mrb[4].mxu0 }
 0x108   : > { %v590_v42 = vmul.f32 %v1756_v40, %v1756_v40  ;;  %v1762_v43 = vpop.f32.mrb[5].mxu0 }
 0x109   : > { %v589_v45 = vmul.f32 %v1762_v43, %v1762_v43 }
 0x10a   : > { %v594_v46 = vadd.f32 %v590_v42, %v586_v41  ;;  %v637_v42 = vld [vmem:[%s404_s19] sm:$0xff] }
 0x10b   : > { %v593_v47 = vadd.f32 %v589_v45, %v585_v44  ;;  %v1768_v48 = vpop.f32.mrb[6].mxu0 }
 0x10c   : > { %v592_v50 = vmul.f32 %v1768_v48, %v1768_v48  ;;  %v1774_v51 = vpop.f32.mrb[7].mxu0 }
 0x10d   : > { %v591_v53 = vmul.f32 %v1774_v51, %v1774_v51 }
 0x10e   : > { %v596_v54 = vadd.f32 %v592_v50, %v588_v49 }
 0x10f   : > { %v1780_v55 = vpop.f32.mrb[8].mxu0  ;;  %v595_v56 = vadd.f32 %v591_v53, %v587_v52  ;;  %v640_v52 = vld [vmem:[%s404_s19 + $0x18] sm:$0xff] }
 0x110   : > { %v598_v57 = vmul.f32 %v1780_v55, %v1780_v55  ;;  %v1784_v58 = vpop.f32.mrb[9].mxu0 }
 0x111   : > { %v597_v59 = vmul.f32 %v1784_v58, %v1784_v58 }
 0x112   : > { %v602_v60 = vadd.f32 %v598_v57, %v594_v46  ;;  %v638_v46 = vld [vmem:[%s404_s19 + $0x8] sm:$0xff] }
 0x113   : > { %v601_v61 = vadd.f32 %v597_v59, %v593_v47  ;;  %v1788_v62 = vpop.f32.mrb[10].mxu0  ;;  %v639_v47 = vld [vmem:[%s404_s19 + $0x10] sm:$0xff]  ;;  %s1605_s19 = smov [#allocation3]  }
 0x114   : > { %v606_v63 = vadd.f32 1e-08, %v602_v60  ;;  %v600_v0 = vmul.f32 %v1788_v62, %v1788_v62  ;;  %v1792_v1 = vpop.f32.mrb[11].mxu0  ;;  %s1542_s21 = sshll.u32 %s1605_s19, 4  ;;  %s1543_s21 = int_to_ptr.vmem [resolvable:$false] %s1542_s21 }
 0x115   : > { %v605_v2 = vadd.f32 1e-08, %v601_v61  ;;  %v599_v3 = vmul.f32 %v1792_v1, %v1792_v1  ;;  %s1544_s23 = scalar_lea.vmem %s1543_s21, 1024 }
 0x116   : > { %v604_v4 = vadd.f32 %v600_v0, %v596_v54  ;;  %1514 = vrsqrt.f32 %v606_v63  ;;  %vm618_vm3 = vcmp.eq.f32.partialorder %v606_v63, inf  ;;  %v621_v23 = vand.u32 2147483648, %v606_v63 }
 0x117   : > { %v603_v5 = vadd.f32 %v599_v3, %v595_v56  ;;  %1516 = vrsqrt.f32 %v605_v2  ;;  %vm611_vm1 = vcmp.eq.f32.partialorder %v605_v2, inf  ;;  %v614_v15 = vand.u32 2147483648, %v605_v2 }
 0x118   : > { %v608_v6 = vadd.f32 1e-08, %v604_v4  ;;  %vm613_vm2 = vcmp.eq.f32.partialorder %v605_v2, 0.0  ;;  %vm620_vm5 = vcmp.eq.f32.partialorder %v606_v63, 0.0 }
 0x119   : > { %v607_v7 = vadd.f32 1e-08, %v603_v5 }
 0x11a   : > { %1518 = vrsqrt.f32 %v608_v6  ;;  %vm632_vm7 = vcmp.eq.f32.partialorder %v608_v6, inf  ;;  %v635_v29 = vand.u32 2147483648, %v608_v6  ;;  %vm634_vm8 = vcmp.eq.f32.partialorder %v608_v6, 0.0 }
 0x11b   : > { %1520 = vrsqrt.f32 %v607_v7  ;;  %vm625_vm4 = vcmp.eq.f32.partialorder %v607_v7, inf  ;;  %v628_v24 = vand.u32 2147483648, %v607_v7  ;;  %vm627_vm6 = vcmp.eq.f32.partialorder %v607_v7, 0.0 }
 0x120   : > { %v1515_v11 = vpop.eup %1514 }
 0x121   : > { %v1517_v12 = vpop.eup %1516  ;;  %v617_v14 = vmul.f32 %v1515_v11, %v606_v63 }
 0x122   : > { %v610_v13 = vmul.f32 %v1517_v12, %v605_v2 }
 0x123   : > { %v619_v20 = vsel %vm618_vm3, %v606_v63, %v617_v14 }
 0x124   : > { %v1519_v16 = vpop.eup %1518  ;;  %v612_v17 = vsel %vm611_vm1, %v605_v2, %v610_v13  ;;  %v622_v26 = vsel %vm620_vm5, %v621_v23, %v619_v20  ;;  %v891_v23 = vld [vmem:[%s1978_s6 + $0x8] sm:$0xff] }
 0x125   : > { %v1521_v18 = vpop.eup %1520  ;;  %v615_v19 = vsel %vm613_vm2, %v614_v15, %v612_v17  ;;  %v631_v22 = vmul.f32 %v1519_v16, %v608_v6 }
 0x126   : > { %653 = vrot.lane.b32.xlu0 %v615_v19, %s1602_s22  ;;  %v624_v21 = vmul.f32 %v1521_v18, %v607_v7 }
 0x127   : > { %v633_v28 = vsel %vm632_vm7, %v608_v6, %v631_v22  ;;  %v890_v22 = vld [vmem:[%s1978_s6] sm:$0xff] }
 0x128   : > { %v626_v25 = vsel %vm625_vm4, %v607_v7, %v624_v21  ;;  %v636_v30 = vsel %vm634_vm8, %v635_v29, %v633_v28  ;;  %v1307_v28 = vld [vmem:[%s1977_s5] ss:$0 sm:$0xff] }
 0x129   : > { %v629_v27 = vsel %vm627_vm6, %v628_v24, %v626_v25  ;;  %v1456_v24 = vpack.c.bf16 %v891_v23, %v890_v22  ;;  %v892_v25 = vld [vmem:[%s1978_s6 + $0x10] sm:$0xff] }
 0x12a   : > { %655 = vrot.lane.b32.xlu0 %v622_v26, %s1602_s22  ;;  %657 = vrot.lane.b32.xlu1 %v629_v27, %s1602_s22  ;;  %v893_v26 = vld [vmem:[%s1978_s6 + $0x18] sm:$0xff] }
 0x12b   : > { %v1460_v27 = vpack.c.bf16 %v893_v26, %v892_v25 }
 0x12e   : > { %1002 = vrot.lane.b32.xlu0 %v1750_v37, %s1602_s22  ;;  %659 = vrot.lane.b32.xlu1 %v636_v30, %s1602_s22 }
 0x132   : > { %1006 = vrot.lane.b32.xlu0 %v1754_v39, %s1602_s22  ;;  %1004 = vrot.lane.b32.xlu1 %v1748_v36, %s1602_s22 }
 0x136   : > { %1022 = vrot.lane.b32.xlu0 %v1762_v43, %s1602_s22  ;;  %1008 = vrot.lane.b32.xlu1 %v1752_v38, %s1602_s22 }
 0x13a   : > { %1026 = vrot.lane.b32.xlu0 %v1774_v51, %s1602_s22  ;;  %1024 = vrot.lane.b32.xlu1 %v1756_v40, %s1602_s22 }
 0x13e   : > { %1046 = vrot.lane.b32.xlu0 %v1784_v58, %s1602_s22  ;;  %1028 = vrot.lane.b32.xlu1 %v1768_v48, %s1602_s22 }
 0x142   : > { %1050 = vrot.lane.b32.xlu0 %v1792_v1, %s1602_s22  ;;  %1048 = vrot.lane.b32.xlu1 %v1780_v55, %s1602_s22 }
 0x146   : > { %1052 = vrot.lane.b32.xlu1 %v1788_v62, %s1602_s22 }
 0x198   : > { %v654_v31 = vpop.permute.xlu0 %653 }
 0x199   : > { %1398 = vmatprep.mubr.msk.f32.mxu1 %vm423_vm0, %v654_v31 }
 0x19c   : > { %v656_v35 = vpop.permute.xlu0 %655  ;;  %v658_v41 = vpop.permute.xlu1 %657 }
 0x19d   : > { %1399 = vmatmul.mubr.msk.f32.vlgmr.msra.gmra.mrb[0].mxu1 %vm423_vm0, %v656_v35 }
 0x19e   : > { %1451 = vmatpush3.bf16.msra.mxu1 %v1448_v10  ;;  %1401 = vmatprep.mubr.msk.f32.mxu1 %vm423_vm0, %v658_v41 }
 0x19f   : > { %1453 = vmatprep.subr.bf16.mxu1 %v1452_v34 }
 0x1a0   : > { %v1003_v44 = vpop.permute.xlu0 %1002  ;;  %v660_v45 = vpop.permute.xlu1 %659 }
 0x1a1   : > { %1402 = vmatmul.mubr.msk.f32.gmra.mrb[2].mxu1 %vm423_vm0, %v660_v45  ;;  %v1014_v56 = vmul.f32 %v1003_v44, %v1750_v37 }
 0x1a2   : > { %1455 = vmatpush3.bf16.msra.mxu1 %v1452_v34  ;;  %1412 = vmatprep.mubr.msk.f32.mxu1 %vm423_vm0, %v637_v42 }
 0x1a3   : > { %1457 = vmatprep.subr.bf16.mxu1 %v1456_v24 }
 0x1a4   : > { %v1007_v49 = vpop.permute.xlu0 %1006  ;;  %v1005_v50 = vpop.permute.xlu1 %1004 }
 0x1a5   : > { %1413 = vmatmul.mubr.msk.f32.vlgmr.msra.gmra.mrb[0].mxu1 %vm423_vm0, %v638_v46  ;;  %v1016_v63 = vmul.f32 %v1007_v49, %v1754_v39  ;;  %v1015_v0 = vmul.f32 %v1748_v36, %v1005_v50 }
 0x1a6   : > { %1415 = vmatprep.mubr.msk.f32.mxu1 %vm423_vm0, %v639_v47  ;;  %1459 = vmatpush3.bf16.msra.mxu1 %v1456_v24 }
 0x1a7   : > { %1461 = vmatprep.subr.bf16.mxu1 %v1460_v27 }
 0x1a8   : > { %v1023_v53 = vpop.permute.xlu0 %1022  ;;  %v1009_v54 = vpop.permute.xlu1 %1008 }
 0x1a9   : > { %v1034_v57 = vmul.f32 %v1023_v53, %v1762_v43  ;;  %1416 = vmatmul.mubr.msk.f32.gmra.mrb[2].mxu1 %vm423_vm0, %v640_v52  ;;  %v1017_v8 = vmul.f32 %v1752_v38, %v1009_v54 }
 0x1aa   : > { %1463 = vmatpush3.bf16.msra.mxu1 %v1460_v27 }
 0x1ab   : > { %v1038_v59 = vadd.f32 %v1034_v57, %v1014_v56 }
 0x1ac   : > { %v1027_v60 = vpop.permute.xlu0 %1026  ;;  %v1025_v61 = vpop.permute.xlu1 %1024 }
 0x1ad   : > { %v1036_v2 = vmul.f32 %v1027_v60, %v1774_v51  ;;  %v1035_v3 = vmul.f32 %v1756_v40, %v1025_v61 }
 0x1af   : > { %v1040_v4 = vadd.f32 %v1036_v2, %v1016_v63  ;;  %v1039_v5 = vadd.f32 %v1035_v3, %v1015_v0 }
 0x1b0   : > { %v1047_v6 = vpop.permute.xlu0 %1046  ;;  %v1029_v7 = vpop.permute.xlu1 %1028 }
 0x1b1   : > { %v1058_v9 = vmul.f32 %v1047_v6, %v1784_v58  ;;  %v1037_v10 = vmul.f32 %v1768_v48, %v1029_v7 }
 0x1b3   : > { %v1062_v11 = vadd.f32 %v1058_v9, %v1038_v59  ;;  %v1041_v12 = vadd.f32 %v1037_v10, %v1017_v8 }
 0x1b4   : > { %v1051_v13 = vpop.permute.xlu0 %1050  ;;  %v1049_v14 = vpop.permute.xlu1 %1048 }
 0x1b5   : > { %v1060_v15 = vmul.f32 %v1051_v13, %v1792_v1  ;;  %v1059_v16 = vmul.f32 %v1780_v55, %v1049_v14  ;;  %1070 = vrot.lane.b32.xlu0 %v1062_v11, %s1603_s20 }
 0x1b7   : > { %v1064_v17 = vadd.f32 %v1060_v15, %v1040_v4  ;;  %v1063_v18 = vadd.f32 %v1059_v16, %v1039_v5  ;;  %v1312_v5 = vld [vmem:[%s1979_s7] ss:$0 sm:$0xff] }
 0x1b8   : > { %v1053_v19 = vpop.permute.xlu1 %1052 }
 0x1b9   : > { %v1061_v20 = vmul.f32 %v1788_v62, %v1053_v19  ;;  %1074 = vrot.lane.b32.xlu0 %v1064_v17, %s1603_s20  ;;  %1072 = vrot.lane.b32.xlu1 %v1063_v18, %s1603_s20 }
 0x1bb   : > { %v1065_v21 = vadd.f32 %v1061_v20, %v1041_v12 }
 0x1bd   : > { %1076 = vrot.lane.b32.xlu1 %v1065_v21, %s1603_s20 }
 0x227   : > { %v1071_v8 = vpop.permute.xlu0 %1070 }
 0x22b   : > { %v1073_v6 = vpop.permute.xlu1 %1072  ;;  %v1075_v19 = vpop.permute.xlu0 %1074 }
 0x22f   : > { %v1077_v17 = vpop.permute.xlu1 %1076 }
 0x278   : > { %v1414_v29 = vpop.f32.mrb[0].mxu1 }
 0x279   : > { %v859_v30 = vadd.f32 %v1414_v29, %v1307_v28  ;;  %v832_v31 = vpop.f32.mrb[1].mxu1 }
 0x27a   : > { %v858_v32 = vadd.f32 %v1307_v28, %v832_v31 }
 0x27b   : > { %v1309_v33 = vmul.f32 -1.442695, %v859_v30 }
 0x27c   : > { %v1308_v34 = vmul.f32 -1.442695, %v858_v32  ;;  %v1417_v35 = vpop.f32.mrb[2].mxu1 }
 0x27d   : > { %1522 = vpow2.f32 %v1309_v33  ;;  %v861_v41 = vadd.f32 %v1417_v35, %v1307_v28  ;;  %v842_v42 = vpop.f32.mrb[3].mxu1 }
 0x27e   : > { %1524 = vpow2.f32 %v1308_v34  ;;  %v860_v44 = vadd.f32 %v1307_v28, %v842_v42 }
 0x27f   : > { %v1311_v45 = vmul.f32 -1.442695, %v861_v41 }
 0x280   : > { %v1310_v46 = vmul.f32 -1.442695, %v860_v44 }
 0x281   : > { %1526 = vpow2.f32 %v1311_v45 }
 0x282   : > { %1528 = vpow2.f32 %v1310_v46 }
 0x287   : > { %v1523_v47 = vpop.eup %1522 }
 0x288   : > { %v1525_v49 = vpop.eup %1524  ;;  %v875_v50 = vadd.f32 1.0, %v1523_v47 }
 0x289   : > { %v874_v52 = vadd.f32 1.0, %v1525_v49 }
 0x28a   : > { %1530 = vrcp.f32 %v875_v50 }
 0x28b   : > { %v1527_v53 = vpop.eup %1526  ;;  %1532 = vrcp.f32 %v874_v52 }
 0x28c   : > { %v1529_v54 = vpop.eup %1528  ;;  %v877_v56 = vadd.f32 1.0, %v1527_v53 }
 0x28d   : > { %v876_v57 = vadd.f32 1.0, %v1529_v54 }
 0x28e   : > { %1534 = vrcp.f32 %v877_v56 }
 0x28f   : > { %1536 = vrcp.f32 %v876_v57 }
 0x294   : > { %v1531_v59 = vpop.eup %1530 }
 0x295   : > { %v1533_v60 = vpop.eup %1532  ;;  %v887_v63 = vmul.f32 %v1531_v59, %v859_v30 }
 0x296   : > { %v886_v61 = vmul.f32 %v1533_v60, %v858_v32 }
 0x298   : > { %v1535_v0 = vpop.eup %1534  ;;  %1426 = vmatprep.mubr.msk.f32.mxu1 %vm423_vm0, %v886_v61 }
 0x299   : > { %v1537_v2 = vpop.eup %1536  ;;  %1427 = vmatmul.mubr.msk.f32.vlgmr.msra.gmra.mrb[4].mxu1 %vm423_vm0, %v887_v63  ;;  %v889_v4 = vmul.f32 %v1535_v0, %v861_v41 }
 0x29a   : > { %v888_v3 = vmul.f32 %v1537_v2, %v860_v44 }
 0x29c   : > { %1429 = vmatprep.mubr.msk.f32.mxu1 %vm423_vm0, %v888_v3 }
 0x29d   : > { %1430 = vmatmul.mubr.msk.f32.gmra.mrb[6].mxu1 %vm423_vm0, %v889_v4 }
 0x36c   : > { %v1428_v7 = vpop.f32.mrb[4].mxu1 }
 0x36d   : > { %v985_v9 = vadd.f32 %v1428_v7, %v1312_v5  ;;  %v979_v10 = vpop.f32.mrb[5].mxu1 }
 0x36e   : > { %v980_v11 = vadd.f32 %v1312_v5, %v979_v10 }
 0x36f   : > { %v1083_v12 = vmul.f32 %v1073_v6, %v985_v9  ;;  %v1111_v22 = vmul.f32 %v1756_v40, %v985_v9  ;;  %v1115_v26 = vmul.f32 %v1780_v55, %v985_v9  ;;  %v1107_v42 = vmul.f32 %v1748_v36, %v985_v9 }
 0x370   : > { %v1431_v13 = vpop.f32.mrb[6].mxu1  ;;  %v1082_v14 = vmul.f32 %v1071_v8, %v980_v11  ;;  %v1110_v23 = vmul.f32 %v980_v11, %v1762_v43  ;;  %v1114_v25 = vmul.f32 %v980_v11, %v1784_v58  ;;  %v1106_v45 = vmul.f32 %v980_v11, %v1750_v37 }
 0x371   : > { %v995_v15 = vadd.f32 %v1431_v13, %v1312_v5  ;;  %v989_v16 = vpop.f32.mrb[7].mxu1  ;;  %1092 = vrot.lane.b32.xlu1 %v1083_v12, %s1602_s22 }
 0x372   : > { %v990_v18 = vadd.f32 %v1312_v5, %v989_v16  ;;  %1090 = vrot.lane.b32.xlu0 %v1082_v14, %s1602_s22 }
 0x373   : > { %v1085_v20 = vmul.f32 %v1077_v17, %v995_v15  ;;  %v1113_v24 = vmul.f32 %v1768_v48, %v995_v15  ;;  %v1117_v40 = vmul.f32 %v1788_v62, %v995_v15  ;;  %v1109_v52 = vmul.f32 %v1752_v38, %v995_v15 }
 0x374   : > { %v1084_v21 = vmul.f32 %v1075_v19, %v990_v18  ;;  %v1112_v27 = vmul.f32 %v990_v18, %v1774_v51  ;;  %v1116_v43 = vmul.f32 %v990_v18, %v1792_v1  ;;  %v1108_v37 = vmul.f32 %v990_v18, %v1754_v39 }
 0x375   : > { %1096 = vrot.lane.b32.xlu1 %v1085_v20, %s1602_s22 }
 0x376   : > { %1094 = vrot.lane.b32.xlu0 %v1084_v21, %s1602_s22  ;;  %s1284_s22 = sshll.u32 %s1718_s17, 5 }
 0x379   : > { %1124 = vrot.lane.b32.xlu1 %v1111_v22, %s1604_s24 }
 0x37a   : > { %1122 = vrot.lane.b32.xlu0 %v1110_v23, %s1604_s24 }
 0x37d   : > { %1128 = vrot.lane.b32.xlu1 %v1113_v24, %s1604_s24 }
 0x37e   : > { %1138 = vrot.lane.b32.xlu0 %v1114_v25, %s1603_s20 }
 0x381   : > { %1140 = vrot.lane.b32.xlu1 %v1115_v26, %s1603_s20 }
 0x382   : > { %1126 = vrot.lane.b32.xlu0 %v1112_v27, %s1604_s24 }
 0x385   : > { %1144 = vrot.lane.b32.xlu1 %v1117_v40, %s1603_s20 }
 0x386   : > { %1142 = vrot.lane.b32.xlu0 %v1116_v43, %s1603_s20 }
 0x3e3   : > { %v1093_v48 = vpop.permute.xlu1 %1092 }
 0x3e4   : > { %v1103_v58 = vadd.f32 %v1093_v48, %v985_v9  ;;  %v1091_v28 = vpop.permute.xlu0 %1090 }
 0x3e5   : > { %v1102_v29 = vadd.f32 %v1091_v28, %v980_v11 }
 0x3e6   : > { %1156 = vrot.lane.b32.xlu1 %v1103_v58, %s1603_s20 }
 0x3e7   : > { %1154 = vrot.lane.b32.xlu0 %v1102_v29, %s1603_s20  ;;  %v1097_v51 = vpop.permute.xlu1 %1096 }
 0x3e8   : > { %v1105_v55 = vadd.f32 %v1097_v51, %v995_v15  ;;  %v1095_v30 = vpop.permute.xlu0 %1094 }
 0x3e9   : > { %v1104_v31 = vadd.f32 %v1095_v30, %v990_v18 }
 0x3ea   : > { %1160 = vrot.lane.b32.xlu1 %v1105_v55, %s1603_s20 }
 0x3eb   : > { %1158 = vrot.lane.b32.xlu0 %v1104_v31, %s1603_s20  ;;  %v1125_v62 = vpop.permute.xlu1 %1124  ;;  %s398_s20 = scalar_lea.vmem [#allocation3], %s1284_s22 }
 0x3ec   : > { %v1123_v1 = vpop.permute.xlu0 %1122  ;;  %v1167_v46 = vsel %vm423_vm0, %v1107_v42, %v1125_v62  ;;  %s1198_s25 = sshll.u32 %s398_s20, 4  ;;  %s1919_s25 = int_to_ptr.vmem [resolvable:$true] %s1198_s25 }
 0x3ed   : > { %v1166_v47 = vsel %vm423_vm0, %v1106_v45, %v1123_v1  ;;  %s1538_s18 = scalar_lea.vmem %s1919_s25, 512  ;;  %p1545_p3 = scmp.lt.s32.totalorder %s1919_s25, %s1543_s21 }
 0x3ee   : > { %p1539_p0 = scmp.ne.s32.totalorder %s1919_s25, %s1538_s18  ;;  %p1546_p4 = scmp.lt.s32.totalorder %s1544_s23, %s1538_s18 }
 0x3ef   : > { %v1129_v32 = vpop.permute.xlu1 %1128 }
 0x3f0   : > { %v1139_v33 = vpop.permute.xlu0 %1138  ;;  %v1169_v57 = vsel %vm423_vm0, %v1109_v52, %v1129_v32  ;;  %p1540_p1 = pnand %p1539_p0, %p1692_p6  ;;  %p1547_p5 = por %p1546_p4, %p1545_p3 }
 0x3f1   : > { %v1171_v53 = vsel %vm1170_vm9, %v1166_v47, %v1139_v33 }
 0x3f2   : > { %p1541_p2 = pneg %p1540_p1 }
 0x3f3   : > { %v1141_v34 = vpop.permute.xlu1 %1140 }
 0x3f4   : > { %v1127_v35 = vpop.permute.xlu0 %1126  ;;  %v1172_v49 = vsel %vm1170_vm9, %v1167_v46, %v1141_v34  ;;  %p1548_p7 = pnand %p1547_p5, %p1541_p2 }
 0x3f5   : > { %v1168_v38 = vsel %vm423_vm0, %v1108_v37, %v1127_v35 }
 0x3f7   : > { %v1145_v41 = vpop.permute.xlu1 %1144 }
 0x3f8   : > { %v1143_v44 = vpop.permute.xlu0 %1142  ;;  %v1174_v59 = vsel %vm1170_vm9, %v1169_v57, %v1145_v41 }
 0x3f9   : > { %v1173_v39 = vsel %vm1170_vm9, %v1168_v38, %v1143_v44 }
 0x458   : > { %v1157_v50 = vpop.permute.xlu1 %1156 }
 0x459   : > { %v1177_v36 = vsel %vm1175_vm10, %v1172_v49, %v1157_v50  ;;  %v1155_v54 = vpop.permute.xlu0 %1154 }
 0x45a   : > { %1181 = vst [vmem:[%s398_s20 + $0x8] sm:$0xff] %v1177_v36  ;;  %v1176_v56 = vsel %vm1175_vm10, %v1171_v53, %v1155_v54 }
 0x45b   : > { %1180 = vst [vmem:[%s398_s20] sm:$0xff] %v1176_v56 }
 0x45c   : > { %v1161_v60 = vpop.permute.xlu1 %1160 }
 0x45d   : > { %v1179_v61 = vsel %vm1175_vm10, %v1174_v59, %v1161_v60  ;;  %v1159_v63 = vpop.permute.xlu0 %1158 }
 0x45e   : > { %1183 = vst [vmem:[%s398_s20 + $0x18] sm:$0xff] %v1179_v61  ;;  %v1178_v0 = vsel %vm1175_vm10, %v1173_v39, %v1159_v63 }
 0x45f   : > { %1182 = vst [vmem:[%s398_s20 + $0x10] sm:$0xff] %v1178_v0 }
 0x460   : > { %1551 = shalt.err (!%p1548_p7)
}
 0x461   : > { %s1552_s24 = scalar_lea.hbm %s1926_s12, 512  ;;  %s1556_s26 = scalar_lea.hbm %s1980_s8, 2048 }
 0x462   : > { %p1553_p9 = scmp.ne.s32.totalorder %s1926_s12, %s1552_s24  ;;  %p1557_p12 = scmp.lt.u32.totalorder %s1926_s12, %s1980_s8 }
 0x463   : > { %p1558_p13 = scmp.lt.u32.totalorder %s1556_s26, %s1552_s24  ;;  %p1560_p1 = scmp.lt.u32.totalorder %s1552_s24, %s1926_s12 }
 0x464   : > { %p1554_p10 = pnand %p1553_p9, %p1692_p6 }
 0x465   : > { %p1559_p0 = por %p1558_p13, %p1557_p12 }
 0x466   : > { %p1555_p11 = pneg %p1554_p10 }
 0x467   : > { %p1561_p2 = por %p1560_p1, %p1559_p0 }
 0x469   : > { %p1562_p3 = pnand %p1561_p2, %p1555_p11 }
 0x46b   : > { %1565 = shalt.err (!%p1562_p3)
}
 0x46c   : > { %s1606_s18 = smov 128   ;;  %s1607_s19 = smov 8  }
 0x46d   : > { %1470 = dma.vmem_to_hbm [thread:$0]  (%p1692_p6), %s1919_s25, 512, %s1926_s12, %s1185_s13, %s1606_s18, %s1606_s18, %s1607_s19  }
 0x46e PF: > { %p1476_p4 = scmp.ge.s32.totalorder %s1600_s30, 2  ;;  %s1213_s21 = sand.u32 1, %s1588_s27  }
 0x46f   : > { %s1214_s23 = scalar_lea.sflag [#allocation4], %s1213_s21 }
 0x470   : > { %p1473_p5 = pnand %p1476_p4, %p1696_p8 }
 0x472   : > { %1583 = dma.done.wait (!%p1473_p5), %s1214_s23, 512  }
 0x473   : > { %1585 = vsyncadd (!%p1473_p5), %s1214_s23, 4294966784  ;;  %p18_p7 = scmp.ge.s32.totalorder %s1678_s11, 6   ;;  %s1983_s27 = smov %s1592_s28 }
 0x474   : > { %s1984_s28 = smov %s1596_s29  ;;  %s1985_s29 = smov %s1690_s14 }
 0x475   : > { %s1986_s30 = smov %s1678_s11  ;;  %20 = sbr.rel (!%p18_p7) target bundleno = 3 (0x3), region = 133 }
 0x47c   :  { %1219 = vsyncpa [#allocation4], 1 }
 0x47d   :  { %1221 = vsyncpa [#allocation4 + $0x1], 1 }

</bundles_post_ra>
